<compile_context>
chip_gen: v5e
topology: v5e:2x2
jax: 0.10.0
libtpu: 0.0.40
codegen_flags: <defaults>
</compile_context>

<pallas_src>
import jax
import jax.numpy as jnp
from jax.experimental import pallas as pl
from jax.experimental.pallas import tpu as pltpu


def nm_kernel(x_ref, w1_ref, b1_ref, w2_ref, b2_ref, out_ref):
    """Fused forward on one packed batch tile.

    x_ref  : (TB, P*insize)  f32   (packed: P consecutive batch rows per row)
    w1_ref : (P*insize, P*hidden) bf16, block-diagonal fused low-rank fc1
    b1_ref : (1, P*hidden)   f32
    w2_ref : (P*hidden, P*outsize) bf16, block-diagonal fc2
    b2_ref : (1, P*outsize)  f32
    out_ref: (TB, P*outsize) f32
    """
    # Cast to bf16 in-kernel (VPU, hidden under the DMA) -> x is read from HBM
    # exactly once, as f32, with no separate wrapper-side cast pass.
    x = x_ref[...].astype(jnp.bfloat16)
    # fc1 (block-diagonal fused low-rank linear), bf16 operands, f32 MXU acc.
    h = jnp.dot(x, w1_ref[...], preferred_element_type=jnp.float32)
    h = jnp.maximum(h + b1_ref[...], 0.0)                       # bias + ReLU, f32
    # fc2: bf16 operands again (K is tiny), f32 accumulation.
    o = jnp.dot(h.astype(jnp.bfloat16), w2_ref[...],
                preferred_element_type=jnp.float32)
    out_ref[...] = (o + b2_ref[...]).astype(out_ref.dtype)


def nm_forward(x, params, *, pack=4, tb_max=8192):
    """x: (B, insize) float.  params = (wb, wa, b1, w2, b2), PyTorch-style layout."""
    wb, wa, b1, w2, b2 = params
    B, insize = x.shape
    hidden = wa.shape[0]          # 4
    outsize = w2.shape[0]
    P = pack

    # ---- wrapper-side (tiny / one-time) weight plumbing --------------------
    w1_t = (wa @ wb).T                                   # (insize, hidden) fused factors
    w2_t = w2.T                                          # (hidden, outsize)
    eye_p = jnp.eye(P, dtype=jnp.float32)
    w1_p = jnp.kron(eye_p, w1_t).astype(jnp.bfloat16)    # (P*insize, P*hidden) block-diag
    w2_p = jnp.kron(eye_p, w2_t).astype(jnp.bfloat16)    # (P*hidden, P*outsize) block-diag
    b1_p = jnp.tile(b1.reshape(1, hidden).astype(jnp.float32), (1, P))    # (1, P*hidden)
    b2_p = jnp.tile(b2.reshape(1, outsize).astype(jnp.float32), (1, P))   # (1, P*outsize)

    # ---- pack P batch rows per logical row (free reshape when B % P == 0) --
    rem = B % P
    if rem:
        # Rare path: pad < P rows so the packing reshape is legal.
        x = jnp.pad(x, ((0, P - rem), (0, 0)))
    bp = x.shape[0] // P                                 # packed rows
    kin, khid, kout = P * insize, P * hidden, P * outsize
    xp = x.reshape(bp, kin)                              # lane-dense packed input

    # ---- batch tiling: big tiles, multiple of 8 sublanes, ragged tail ------
    tb = min(tb_max, -(-bp // 8) * 8)
    tb = max(8, (tb // 8) * 8)
    grid = (pl.cdiv(bp, tb),)                            # last block padded by Pallas

    out = pl.pallas_call(
        nm_kernel,
        out_shape=jax.ShapeDtypeStruct((bp, kout), jnp.float32),
        grid=grid,
        in_specs=[
            pl.BlockSpec((tb, kin), lambda i: (i, 0)),   # x tile (streamed)
            pl.BlockSpec((kin, khid), lambda i: (0, 0)),  # W1 block-diag (resident)
            pl.BlockSpec((1, khid), lambda i: (0, 0)),    # b1 (resident)
            pl.BlockSpec((khid, kout), lambda i: (0, 0)),  # W2 block-diag (resident)
            pl.BlockSpec((1, kout), lambda i: (0, 0)),     # b2 (resident)
        ],
        out_specs=pl.BlockSpec((tb, kout), lambda i: (i, 0)),
        compiler_params=pltpu.CompilerParams(
            dimension_semantics=("parallel",),           # batch splits across TCs (v7x)
            vmem_limit_bytes=32 * 1024 * 1024),
    )(xp, w1_p, b1_p, w2_p, b2_p)

    # Free unpack back to (B, outsize); padded rows (if any) sliced off.
    return out.reshape(bp * P, outsize)[:B]


def init_params(key, insize, outsize, hidden=4, rank=3):
    """Deterministic, PyTorch-Linear-style uniform init."""
    k1, k2, k3, k4, k5 = jax.random.split(key, 5)

    def unif(k, shape, fan_in):
        bound = 1.0 / jnp.sqrt(jnp.asarray(fan_in, jnp.float32))
        return jax.random.uniform(k, shape, jnp.float32, -bound, bound)

    wb = unif(k1, (rank, insize), insize)       # factor B of fc1
    wa = unif(k2, (hidden, rank), rank)         # factor A of fc1
    b1 = unif(k3, (1, hidden), insize)          # fc1 bias
    w2 = unif(k4, (outsize, hidden), hidden)    # fc2 weight
    b2 = unif(k5, (1, outsize), hidden)         # fc2 bias
    return wb, wa, b1, w2, b2


def nm_reference(x, params):
    wb, wa, b1, w2, b2 = params
    h = jnp.maximum(x @ wb.T @ wa.T + b1, 0.0)
    return h @ w2.T + b2


if __name__ == "__main__":
    insize, outsize = 32, 8
    key = jax.random.PRNGKey(0)
    kx1, kx2, kp = jax.random.split(key, 3)
    params = init_params(kp, insize, outsize)

    # Case 1: aligned batch (multiple of pack=4), single grid step, default tile.
    x1 = jax.random.normal(kx1, (64, insize), jnp.float32)
    out1 = jax.block_until_ready(nm_forward(x1, params))
    ref1 = nm_reference(x1, params)
    assert out1.shape == ref1.shape
    assert jnp.allclose(out1, ref1, atol=3e-2, rtol=3e-2), \
        float(jnp.max(jnp.abs(out1 - ref1)))

    # Case 2: ragged batch (101 % 4 != 0) with a small tile so the grid has two
    # steps and a padded last block (exercises P-pad, multi-step parallel grid,
    # and Pallas ragged-block read-pad / write-discard).
    x2 = jax.random.normal(kx2, (101, insize), jnp.float32)
    out2 = jax.block_until_ready(nm_forward(x2, params, tb_max=16))
    ref2 = nm_reference(x2, params)
    assert out2.shape == ref2.shape
    assert jnp.allclose(out2, ref2, atol=3e-2, rtol=3e-2), \
        float(jnp.max(jnp.abs(out2 - ref2)))

    print("KERNEL_OK")
</pallas_src>

<mosaic_0001>
module attributes {stable_mosaic.version = 11 : i64} {
  func.func @nm_kernel(%arg0: i32, %arg1: memref<16x128xf32, #tpu.memory_space<vmem>>, %arg2: memref<128x16xbf16, #tpu.memory_space<vmem>>, %arg3: memref<1x16xf32, #tpu.memory_space<vmem>>, %arg4: memref<16x32xbf16, #tpu.memory_space<vmem>>, %arg5: memref<1x32xf32, #tpu.memory_space<vmem>>, %arg6: memref<16x32xf32, #tpu.memory_space<vmem>>) attributes {dimension_semantics = [#tpu.dimension_semantics<parallel>], iteration_bounds = array<i64: 1>, scalar_prefetch = 0 : i64, scratch_operands = 0 : i64, tpu.core_type = #tpu.core_type<tc>, window_params = [{transform_indices = @transform_0, window_bounds = array<i64: 16, 128>}, {pipeline_mode = #tpu.pipeline_mode<synchronous>, transform_indices = @transform_1, window_bounds = array<i64: 128, 16>}, {pipeline_mode = #tpu.pipeline_mode<synchronous>, transform_indices = @transform_2, window_bounds = array<i64: 1, 16>}, {pipeline_mode = #tpu.pipeline_mode<synchronous>, transform_indices = @transform_3, window_bounds = array<i64: 16, 32>}, {pipeline_mode = #tpu.pipeline_mode<synchronous>, transform_indices = @transform_4, window_bounds = array<i64: 1, 32>}, {transform_indices = @transform_5, window_bounds = array<i64: 16, 32>}]} {
    %c0 = arith.constant 0 : index
    %c0_0 = arith.constant 0 : index
    %0 = vector.load %arg1[%c0, %c0_0] : memref<16x128xf32, #tpu.memory_space<vmem>>, vector<16x128xf32>
    %1 = arith.truncf %0 : vector<16x128xf32> to vector<16x128xbf16>
    %c0_1 = arith.constant 0 : index
    %c0_2 = arith.constant 0 : index
    %2 = vector.load %arg2[%c0_1, %c0_2] : memref<128x16xbf16, #tpu.memory_space<vmem>>, vector<128x16xbf16>
    %cst = arith.constant dense<0.000000e+00> : vector<16x16xf32>
    %3 = tpu.matmul %1, %2, %cst {dimension_numbers = #tpu.dot_dimension_numbers<[1], [0], [0], [1], [0, 0, 1, 1], [], []>} : vector<16x128xbf16>, vector<128x16xbf16>, vector<16x16xf32> -> vector<16x16xf32>
    %c0_3 = arith.constant 0 : index
    %c0_4 = arith.constant 0 : index
    %4 = vector.load %arg3[%c0_3, %c0_4] : memref<1x16xf32, #tpu.memory_space<vmem>>, vector<1x16xf32>
    %5 = vector.broadcast %4 : vector<1x16xf32> to vector<16x16xf32>
    %6 = arith.addf %3, %5 : vector<16x16xf32>
    %cst_5 = arith.constant 0.000000e+00 : f32
    %7 = vector.broadcast %cst_5 : f32 to vector<16x16xf32>
    %8 = arith.maximumf %6, %7 : vector<16x16xf32>
    %9 = arith.truncf %8 : vector<16x16xf32> to vector<16x16xbf16>
    %c0_6 = arith.constant 0 : index
    %c0_7 = arith.constant 0 : index
    %10 = vector.load %arg4[%c0_6, %c0_7] : memref<16x32xbf16, #tpu.memory_space<vmem>>, vector<16x32xbf16>
    %cst_8 = arith.constant dense<0.000000e+00> : vector<16x32xf32>
    %11 = tpu.matmul %9, %10, %cst_8 {dimension_numbers = #tpu.dot_dimension_numbers<[1], [0], [0], [1], [0, 0, 1, 1], [], []>} : vector<16x16xbf16>, vector<16x32xbf16>, vector<16x32xf32> -> vector<16x32xf32>
    %c0_9 = arith.constant 0 : index
    %c0_10 = arith.constant 0 : index
    %12 = vector.load %arg5[%c0_9, %c0_10] : memref<1x32xf32, #tpu.memory_space<vmem>>, vector<1x32xf32>
    %13 = vector.broadcast %12 : vector<1x32xf32> to vector<16x32xf32>
    %14 = arith.addf %11, %13 : vector<16x32xf32>
    %c0_11 = arith.constant 0 : index
    %c0_12 = arith.constant 0 : index
    %15 = vector.load %arg6[%c0_11, %c0_12] : memref<16x32xf32, #tpu.memory_space<vmem>>, vector<16x32xf32>
    tpu.vector_store %arg6[%c0_11, %c0_12], %14 {strides = array<i32>} : memref<16x32xf32, #tpu.memory_space<vmem>>, vector<16x32xf32>,
    return
  }
  func.func @transform_0(%arg0: i32) -> (i32, i32) {
    %c0_i32 = arith.constant 0 : i32
    %c0_i32_0 = arith.constant 0 : i32
    return %arg0, %c0_i32 : i32, i32
  }
  func.func @transform_1(%arg0: i32) -> (i32, i32) {
    %c0_i32 = arith.constant 0 : i32
    %c0_i32_0 = arith.constant 0 : i32
    %c0_i32_1 = arith.constant 0 : i32
    return %c0_i32, %c0_i32_0 : i32, i32
  }
  func.func @transform_2(%arg0: i32) -> (i32, i32) {
    %c0_i32 = arith.constant 0 : i32
    %c0_i32_0 = arith.constant 0 : i32
    %c0_i32_1 = arith.constant 0 : i32
    return %c0_i32, %c0_i32_0 : i32, i32
  }
  func.func @transform_3(%arg0: i32) -> (i32, i32) {
    %c0_i32 = arith.constant 0 : i32
    %c0_i32_0 = arith.constant 0 : i32
    %c0_i32_1 = arith.constant 0 : i32
    return %c0_i32, %c0_i32_0 : i32, i32
  }
  func.func @transform_4(%arg0: i32) -> (i32, i32) {
    %c0_i32 = arith.constant 0 : i32
    %c0_i32_0 = arith.constant 0 : i32
    %c0_i32_1 = arith.constant 0 : i32
    return %c0_i32, %c0_i32_0 : i32, i32
  }
  func.func @transform_5(%arg0: i32) -> (i32, i32) {
    %c0_i32 = arith.constant 0 : i32
    %c0_i32_0 = arith.constant 0 : i32
    return %arg0, %c0_i32 : i32, i32
  }
}

</mosaic_0001>

<bundles_post_ra>
// kernel: tpu_custom_call.1
= control target key start
LH: loop header
LB: loop body
LE: loop exit
PB: predicated region body
PF: predicated region fallthrough
CT: control target
= control target key end

     0   :  { %s313_s0 = inlined_call_operand.vmem [shape: f32[16,128], index: 0, kind: input, shape index: {}]   ;;  %s314_s1 = inlined_call_operand.vmem [shape: bf16[128,16], index: 1, kind: input, shape index: {}]   ;;  %s315_s2 = inlined_call_operand.vmem [shape: f32[1,16], index: 2, kind: input, shape index: {}]   ;;  %s316_s3 = inlined_call_operand.vmem [shape: bf16[16,32], index: 3, kind: input, shape index: {}]   ;;  %s317_s4 = inlined_call_operand.vmem [shape: f32[1,32], index: 4, kind: input, shape index: {}]   ;;  %s318_s5 = inlined_call_operand.hbm [shape: f32[16,32], index: 5, kind: output, shape index: {}]  }
   0x1   :  { %v205_v0 = vld [vmem:[%s314_s1 + $0x38] sm:$0xff]  ;;  %v204_v1 = vld [vmem:[%s314_s1 + $0x30] sm:$0xff] }
   0x2   :  { %93 = vmatpush.bf16.msra.mxu0 %v205_v0 }
   0x3   :  { %10 = vsyncpa [#allocation3], 0  ;;  %v203_v2 = vld [vmem:[%s314_s1 + $0x28] sm:$0xff]  ;;  %v202_v3 = vld [vmem:[%s314_s1 + $0x20] sm:$0xff]  ;;  %vm122_vm0 = vcmask 130048   ;;  %vm140_vm1 = vcmask 261120  }
   0x4   :  { %v201_v4 = vld [vmem:[%s314_s1 + $0x18] sm:$0xff]  ;;  %v200_v5 = vld [vmem:[%s314_s1 + $0x10] sm:$0xff]  ;;  %v199_v6 = vld [vmem:[%s314_s1 + $0x8] sm:$0xff]  ;;  %s149_s19 = sshll.u32 %s318_s5, 4  ;;  %s239_s20 = smov 128   ;;  %s150_s19 = int_to_ptr.hbm [resolvable:$true] %s149_s19 }
   0x5   :  { %v198_v7 = vld [vmem:[%s314_s1] sm:$0xff]  ;;  %v23_v9 = vld [vmem:[%s313_s0 + $0x8] sm:$0xff]  ;;  %s240_s21 = smov 8  }
   0x6   :  { %94 = vmatpush.bf16.msra.mxu0 %v204_v1  ;;  %v22_v8 = vld [vmem:[%s313_s0] sm:$0xff] }
   0x7   :  { %v24_v10 = vpack.c.bf16 %v23_v9, %v22_v8  ;;  %v206_v11 = vld [vmem:[%s316_s3] sm:$0xff]  ;;  %s238_s3 = smov [#allocation2]  }
   0x8   :  { %133 = vmatpush.bf16.msra.mxu1 %v206_v11  ;;  %v210_v13 = vld [vmem:[%s315_s2] ss:$0 sm:$0xff]  ;;  %s147_s17 = sshll.u32 %s238_s3, 4  ;;  %s148_s17 = int_to_ptr.vmem [resolvable:$true] %s147_s17 }
   0x9   :  { %v211_v20 = vld [vmem:[%s317_s4] ss:$0 sm:$0xff] }
   0xa   :  { %95 = vmatpush.bf16.msra.mxu0 %v203_v2 }
   0xe   :  { %96 = vmatpush.bf16.msra.mxu0 %v202_v3 }
  0x12   :  { %97 = vmatpush.bf16.msra.mxu0 %v201_v4 }
  0x16   :  { %98 = vmatpush.bf16.msra.mxu0 %v200_v5 }
  0x1a   :  { %99 = vmatpush.bf16.msra.mxu0 %v199_v6 }
  0x1e   :  { %100 = vmatpush.bf16.msra.mxu0 %v198_v7 }
  0x21   :  { %101 = vmatmul.bf16.vlgmr.msra.gmra.mxu0 %v24_v10 }
  0x9e   :  { %v102_v12 = vpop.f32.mrf.mxu0 }
  0x9f   :  { %v103_v14 = vadd.f32 %v210_v13, %v102_v12 }
  0xa1   :  { %v107_v17 = vmax.f32 %v103_v14, 0.0 }
  0xa6   :  { %v104_v15 = vpop.f32.mrf.mxu0 }
  0xa7   :  { %v105_v16 = vadd.f32 %v210_v13, %v104_v15 }
  0xa9   :  { %v108_v18 = vmax.f32 %v105_v16, 0.0 }
  0xab   :  { %v109_v19 = vpack.c.bf16 %v108_v18, %v107_v17 }
  0xad   :  { %197 = vmatmul.msk.bf16.vlgmr.msra.gmra.mxu1 %vm122_vm0, %v109_v19 }
 0x12a   :  { %v135_v21 = vpop.f32.mrf.mxu1 }
 0x12b   :  { %v136_v22 = vadd.f32 %v211_v20, %v135_v21 }
 0x12d   :  { %141 = vst.msk [vmem:[#allocation2] sm:$0xff] %vm140_vm1, %v136_v22 }
 0x132   :  { %v137_v23 = vpop.f32.mrf.mxu1 }
 0x133   :  { %v138_v24 = vadd.f32 %v211_v20, %v137_v23 }
 0x135   :  { %142 = vst.msk [vmem:[#allocation2 + $0x8] sm:$0xff] %vm140_vm1, %v138_v24 }
 0x136   :  { %155 = dma.vmem_to_hbm [thread:$0]  %s148_s17, 256, %s150_s19, [#allocation3], %s239_s20, %s239_s20, %s240_s21  }
 0x137   :  { %236 = dma.done.wait [#allocation3], 256  }
 0x138   :  { %237 = vsyncadd [#allocation3], 4294967040 }
 0x139   :  { %160 = vsyncpa [#allocation3], 1 }

</bundles_post_ra>
